<compile_context>
chip_gen: v7x
topology: tpu7x:2x2x1
jax: 0.10.0
libtpu: 0.0.40
codegen_flags: <defaults>
</compile_context>

<pallas_src>
import functools

import jax
import jax.numpy as jnp
from jax.experimental import pallas as pl
from jax.experimental.pallas import tpu as pltpu


# ----------------------------------------------------------------------------- kernel

def _positive_linear_kernel(x_ref, w_ref, o_ref, acc_ref, *, apply_relu):
    """Grid = (M tiles, N tiles, K tiles); K (last) is the reduction axis."""

    @pl.when(pl.program_id(2) == 0)
    def _init():
        acc_ref[...] = jnp.zeros_like(acc_ref)

    w = w_ref[...]                                   # (tk, tn) tile of W.T
    if apply_relu:
        # relu is elementwise, so relu(W).T == relu(W.T); VPU work is filler
        # under MXU slack on the f32 path.
        w = jnp.maximum(w, 0.0)

    acc_ref[...] += jnp.dot(                         # (tm, tk) @ (tk, tn) on the MXU
        x_ref[...], w, preferred_element_type=jnp.float32
    )

    @pl.when(pl.program_id(2) == pl.num_programs(2) - 1)
    def _finalize():
        o_ref[...] = acc_ref[...].astype(o_ref.dtype)


# ----------------------------------------------------------------------------- helpers

def _round_up(x, m):
    return ((x + m - 1) // m) * m


def _scoped_vmem_cap():
    """Per-generation VMEM ceiling for the kernel, with headroom."""
    try:
        cap = int(pltpu.get_tpu_info().vmem_capacity_bytes)
    except Exception:
        return 32 * 1024 * 1024          # conservative (safe on v7x's 64 MiB)
    # Leave 16 MiB for XLA-managed scratch outside the kernel; never ask for
    # more than 100 MiB even on 128 MiB parts.
    return max(32 * 1024 * 1024, min(cap - (16 << 20), 100 * 1024 * 1024))


def _weight_spec(tk, tn, depth):
    idx = lambda i, j, k: (k, j)
    if depth > 2:
        try:
            return pl.BlockSpec((tk, tn), idx, pipeline_mode=pl.Buffered(depth))
        except TypeError:                # older jax without pipeline_mode
            pass
    return pl.BlockSpec((tk, tn), idx)


# Below this many flops a plain XLA dot (fusing the relu) beats pad+launch+slice.
_FALLBACK_FLOPS = 1 << 22


# ----------------------------------------------------------------------------- wrapper

def positive_linear(x, weight, *, tm=512, tn=512, tk=1024,
                    use_bf16=False, allow_fallback=True):
    """x: (batch, in_features), weight: (out_features, in_features).

    Returns x @ relu(weight).T with shape (batch, out_features).
    """
    batch, in_features = x.shape
    out_features, in_features_w = weight.shape
    assert in_features == in_features_w

    if allow_fallback and 2 * batch * in_features * out_features < _FALLBACK_FLOPS:
        return jnp.dot(x, jnp.maximum(weight, 0.0).T)

    out_dtype = x.dtype
    row_align = 16 if use_bf16 else 8    # bf16 packs 16 rows per vreg sublane group

    # Hardware-minimum padded dims.
    Mp = _round_up(batch, row_align)
    Np = _round_up(out_features, 128)    # lane-dense output
    Kp = _round_up(in_features, 128)     # lane-aligned contraction

    # Clamp tiles to the padded problem.
    tm = min(tm, Mp)
    tn = min(tn, Np)
    tk = min(tk, Kp)

    M = _round_up(Mp, tm)
    N = _round_up(Np, tn)
    K = _round_up(Kp, tk)

    # v7x has 2 TensorCores sharded over the "parallel" axes; if both parallel
    # axes collapse to a single tile, split one so neither TC idles (harmless
    # elsewhere: same total work, one extra grid step per K tile).
    if M // tm == 1 and N // tn == 1:
        if N >= 2 * 128:
            tn = _round_up(N // 2, 128)
            N = _round_up(Np, tn)
        elif M >= 2 * row_align:
            tm = _round_up(M // 2, row_align)
            M = _round_up(Mp, tm)

    # Zero padding is exact: relu(0) = 0 contributes nothing to the matmul and
    # padded output rows/cols are sliced off below.
    x_p = x
    if (M, K) != (batch, in_features):
        x_p = jnp.pad(x, ((0, M - batch), (0, K - in_features)))

    # One-time (K, N) layout for W: the kernel contracts (tm,tk)x(tk,tn)
    # directly, so no per-(i,j,k) transpose is ever needed.
    wt = weight.T
    if (K, N) != (in_features, out_features):
        wt = jnp.pad(wt, ((0, K - in_features), (0, N - out_features)))

    apply_relu_in_kernel = True
    if use_bf16:
        # Fuse the relu into the already-required f32->bf16 cast pass; avoids
        # emulated bf16 VALU max on v5e on every grid step. f32 accumulate kept.
        wt = jnp.maximum(wt, 0.0).astype(jnp.bfloat16)
        x_p = x_p.astype(jnp.bfloat16)
        apply_relu_in_kernel = False

    gm, gn, gk = M // tm, N // tn, K // tk
    grid = (gm, gn, gk)

    x_bytes = jnp.dtype(x_p.dtype).itemsize
    w_bytes = jnp.dtype(wt.dtype).itemsize
    o_bytes = jnp.dtype(out_dtype).itemsize

    # Pure weight-streaming regime (one M tile): deepen the W pipeline if there
    # are enough W tiles to keep 3 buffers busy.
    w_buffers = 3 if (gm == 1 and gn * gk >= 3) else 2

    # Double-buffered x + (2 or 3)-buffered W + double-buffered out + f32 acc.
    vmem_need = (
        2 * tm * tk * x_bytes
        + w_buffers * tk * tn * w_bytes
        + 2 * tm * tn * o_bytes
        + tm * tn * 4
        + (2 << 20)                      # headroom
    )
    vmem_bytes = min(max(vmem_need, 8 << 20), _scoped_vmem_cap())

    # Bytes include tile re-reads: x is re-read per N tile, W per M tile.
    cost = pl.CostEstimate(
        flops=2 * M * N * K,
        transcendentals=0,
        bytes_accessed=gn * M * K * x_bytes + gm * K * N * w_bytes + M * N * o_bytes,
    )

    kernel = functools.partial(_positive_linear_kernel,
                               apply_relu=apply_relu_in_kernel)

    y_p = pl.pallas_call(
        kernel,
        out_shape=jax.ShapeDtypeStruct((M, N), out_dtype),
        grid_spec=pltpu.PrefetchScalarGridSpec(
            num_scalar_prefetch=0,
            grid=grid,
            in_specs=[
                pl.BlockSpec((tm, tk), lambda i, j, k: (i, k)),   # x tile
                _weight_spec(tk, tn, w_buffers),                  # W.T tile
            ],
            out_specs=pl.BlockSpec((tm, tn), lambda i, j, k: (i, j)),
            scratch_shapes=[pltpu.VMEM((tm, tn), jnp.float32)],
        ),
        compiler_params=pltpu.CompilerParams(
            dimension_semantics=("parallel", "parallel", "arbitrary"),
            vmem_limit_bytes=int(vmem_bytes),
        ),
        cost_estimate=cost,
    )(x_p, wt)

    return y_p[:batch, :out_features]


# ----------------------------------------------------------------------------- tests

if __name__ == "__main__":
    key = jax.random.PRNGKey(0)
    k_x, k_w, k_x2, k_w2, k_x3, k_w3 = jax.random.split(key, 6)

    # 1) Module-sized toy shapes, forced through the Pallas kernel
    #    (single grid point after padding to (8, 128)).
    batch, in_features, out_features = 8, 32, 16
    x = jax.random.normal(k_x, (batch, in_features), dtype=jnp.float32)
    # nn.init.uniform_(weight, 0.001, 0.1) — deterministic synthetic init.
    weight = jax.random.uniform(k_w, (out_features, in_features),
                                dtype=jnp.float32, minval=0.001, maxval=0.1)
    y = positive_linear(x, weight, allow_fallback=False)
    jax.block_until_ready(y)
    y_ref = x @ jnp.maximum(weight, 0.0).T
    assert y.shape == (batch, out_features)
    assert jnp.allclose(y, y_ref, atol=1e-5, rtol=1e-5)

    # 1b) Same shapes through the small-problem XLA fallback.
    y_fb = positive_linear(x, weight)
    jax.block_until_ready(y_fb)
    assert jnp.allclose(y_fb, y_ref, atol=1e-5, rtol=1e-5)

    # 2) Weight-streaming regime: single M tile, N split for the v7x 2-TC guard,
    #    plus non-multiple-of-128 K (exercises padding correctness).
    b2, k2, n2 = 64, 640, 256
    x2 = jax.random.normal(k_x2, (b2, k2), dtype=jnp.float32)
    w2 = jax.random.uniform(k_w2, (n2, k2), dtype=jnp.float32,
                            minval=-0.05, maxval=0.1)
    y2 = positive_linear(x2, w2)
    jax.block_until_ready(y2)
    y2_ref = x2 @ jnp.maximum(w2, 0.0).T
    assert y2.shape == (b2, n2)
    assert jnp.allclose(y2, y2_ref, atol=1e-4, rtol=1e-4)

    # 3) Multi-tile K reduction (accumulator init/finalize path) in f32.
    b3, k3, n3 = 256, 1536, 512
    x3 = jax.random.normal(k_x3, (b3, k3), dtype=jnp.float32)
    w3 = jax.random.uniform(k_w3, (n3, k3), dtype=jnp.float32,
                            minval=-0.05, maxval=0.1)
    y3 = positive_linear(x3, w3)
    jax.block_until_ready(y3)
    y3_ref = x3 @ jnp.maximum(w3, 0.0).T
    assert y3.shape == (b3, n3)
    assert jnp.allclose(y3, y3_ref, atol=1e-3, rtol=1e-4)

    # 4) Optional bf16-compute path (f32 accumulate); looser tolerance.
    y3_bf16 = positive_linear(x3, w3, use_bf16=True)
    jax.block_until_ready(y3_bf16)
    assert jnp.allclose(y3_bf16, y3_ref, atol=5e-2, rtol=2e-2)

    print("KERNEL_OK")
</pallas_src>

<mosaic_0001>
module attributes {stable_mosaic.version = 11 : i64} {
  func.func @_positive_linear_kernel(%arg0: i32, %arg1: i32, %arg2: i32, %arg3: memref<8x128xf32, #tpu.memory_space<vmem>>, %arg4: memref<128x128xf32, #tpu.memory_space<vmem>>, %arg5: memref<8x128xf32, #tpu.memory_space<vmem>>, %arg6: memref<8x128xf32, #tpu.memory_space<vmem>>) attributes {dimension_semantics = [#tpu.dimension_semantics<parallel>, #tpu.dimension_semantics<parallel>, #tpu.dimension_semantics<arbitrary>], iteration_bounds = array<i64: 1, 1, 1>, scalar_prefetch = 0 : i64, scratch_operands = 1 : i64, tpu.core_type = #tpu.core_type<tc>, window_params = [{transform_indices = @transform_0, window_bounds = array<i64: 8, 128>}, {transform_indices = @transform_1, window_bounds = array<i64: 128, 128>}, {transform_indices = @transform_2, window_bounds = array<i64: 8, 128>}]} {
    %c0_i32 = arith.constant 0 : i32
    %0 = arith.cmpi eq, %arg2, %c0_i32 : i32
    %1 = arith.extui %0 : i1 to i32
    %c0_i32_0 = arith.constant 0 : i32
    %2 = arith.cmpi ne, %1, %c0_i32_0 : i32
    scf.if %2 {
      %cst_11 = arith.constant 0.000000e+00 : f32
      %14 = vector.broadcast %cst_11 : f32 to vector<8x128xf32>
      %c0_12 = arith.constant 0 : index
      %c0_13 = arith.constant 0 : index
      %15 = vector.load %arg6[%c0_12, %c0_13] : memref<8x128xf32, #tpu.memory_space<vmem>>, vector<8x128xf32>
      tpu.vector_store %arg6[%c0_12, %c0_13], %14 {strides = array<i32>} : memref<8x128xf32, #tpu.memory_space<vmem>>, vector<8x128xf32>,
    } else {
    }
    %c0 = arith.constant 0 : index
    %c0_1 = arith.constant 0 : index
    %3 = vector.load %arg4[%c0, %c0_1] : memref<128x128xf32, #tpu.memory_space<vmem>>, vector<128x128xf32>
    %cst = arith.constant 0.000000e+00 : f32
    %4 = vector.broadcast %cst : f32 to vector<128x128xf32>
    %5 = arith.maximumf %3, %4 : vector<128x128xf32>
    %c0_2 = arith.constant 0 : index
    %c0_3 = arith.constant 0 : index
    %6 = vector.load %arg6[%c0_2, %c0_3] : memref<8x128xf32, #tpu.memory_space<vmem>>, vector<8x128xf32>
    %c0_4 = arith.constant 0 : index
    %c0_5 = arith.constant 0 : index
    %7 = vector.load %arg3[%c0_4, %c0_5] : memref<8x128xf32, #tpu.memory_space<vmem>>, vector<8x128xf32>
    %cst_6 = arith.constant dense<0.000000e+00> : vector<8x128xf32>
    %8 = tpu.matmul %7, %5, %cst_6 {dimension_numbers = #tpu.dot_dimension_numbers<[1], [0], [0], [1], [0, 0, 1, 1], [], []>} : vector<8x128xf32>, vector<128x128xf32>, vector<8x128xf32> -> vector<8x128xf32>
    %9 = arith.addf %6, %8 : vector<8x128xf32>
    %c0_7 = arith.constant 0 : index
    %c0_8 = arith.constant 0 : index
    %10 = vector.load %arg6[%c0_7, %c0_8] : memref<8x128xf32, #tpu.memory_space<vmem>>, vector<8x128xf32>
    tpu.vector_store %arg6[%c0_7, %c0_8], %9 {strides = array<i32>} : memref<8x128xf32, #tpu.memory_space<vmem>>, vector<8x128xf32>,
    %c0_i32_9 = arith.constant 0 : i32
    %11 = arith.cmpi eq, %arg2, %c0_i32_9 : i32
    %12 = arith.extui %11 : i1 to i32
    %c0_i32_10 = arith.constant 0 : i32
    %13 = arith.cmpi ne, %12, %c0_i32_10 : i32
    scf.if %13 {
      %c0_11 = arith.constant 0 : index
      %c0_12 = arith.constant 0 : index
      %14 = vector.load %arg6[%c0_11, %c0_12] : memref<8x128xf32, #tpu.memory_space<vmem>>, vector<8x128xf32>
      %c0_13 = arith.constant 0 : index
      %c0_14 = arith.constant 0 : index
      %15 = vector.load %arg5[%c0_13, %c0_14] : memref<8x128xf32, #tpu.memory_space<vmem>>, vector<8x128xf32>
      tpu.vector_store %arg5[%c0_13, %c0_14], %14 {strides = array<i32>} : memref<8x128xf32, #tpu.memory_space<vmem>>, vector<8x128xf32>,
    } else {
    }
    return
  }
  func.func @transform_0(%arg0: i32, %arg1: i32, %arg2: i32) -> (i32, i32) {
    %c0_i32 = arith.constant 0 : i32
    return %arg0, %arg2 : i32, i32
  }
  func.func @transform_1(%arg0: i32, %arg1: i32, %arg2: i32) -> (i32, i32) {
    %c0_i32 = arith.constant 0 : i32
    return %arg2, %arg1 : i32, i32
  }
  func.func @transform_2(%arg0: i32, %arg1: i32, %arg2: i32) -> (i32, i32) {
    %c0_i32 = arith.constant 0 : i32
    return %arg0, %arg1 : i32, i32
  }
}

</mosaic_0001>

<bundles_post_ra>
// kernel: tpu_custom_call.1
= control target key start
LH: loop header
LB: loop body
LE: loop exit
PB: predicated region body
PF: predicated region fallthrough
CT: control target
= control target key end

     0   :  { %7 = vsyncpa [#allocation4], 0  ;;  %s392_s0 = inlined_call_operand.hbm [shape: f32[8,128], index: 0, kind: input, shape index: {}]   ;;  %s393_s1 = inlined_call_operand.hbm [shape: f32[128,128], index: 1, kind: input, shape index: {}]   ;;  %s394_s2 = inlined_call_operand.hbm [shape: f32[8,128], index: 2, kind: output, shape index: {}]  }
   0x1   :  { %8 = vsyncpa [#allocation7], 0 }
   0x2   :  { %9 = vsyncpa [#allocation5], 0  ;;  %s326_s9 = smov [#allocation3]   ;;  %s327_s11 = smov [#allocation6]  }
   0x3   :  { %s16_s10 = sshll.u32 %s326_s9, 4  ;;  %s25_s12 = sshll.u32 %s327_s11, 4  ;;  %s17_s10 = int_to_ptr.vmem [resolvable:$true] %s16_s10  ;;  %s349_s12 = int_to_ptr.vmem [resolvable:$true] %s25_s12 }
   0x4   :  { %s254_s15 = scalar_lea.hbm %s392_s0, 128 }
   0x5   :  { %p255_p0 = scmp.ne.s32.totalorder %s392_s0, %s254_s15  ;;  %p258_p1 = scmp.lt.u32.totalorder %s254_s15, %s392_s0 }
   0x7   :  { %p260_p2 = pnand %p258_p1, %p255_p0 }
   0x9   :  { %263 = shalt.err (!%p260_p2)
}
   0xa   :  { %s264_s20 = scalar_lea.vmem %s17_s10, 128  ;;  %p269_p4 = scmp.lt.s32.totalorder %s17_s10, %s17_s10 }
   0xb   :  { %p265_p3 = scmp.ne.s32.totalorder %s17_s10, %s264_s20  ;;  %p270_p5 = scmp.lt.s32.totalorder %s264_s20, %s264_s20 }
   0xd   :  { %p271_p6 = por %p270_p5, %p269_p4 }
   0xf   :  { %p272_p7 = pnand %p271_p6, %p265_p3 }
  0x11   :  { %275 = shalt.err (!%p272_p7)
}
  0x12   :  { %19 = dma.hbm_to_vmem [thread:$0]  %s392_s0, 128, %s17_s10, [#allocation4]  }
  0x13   :  { %s276_s25 = scalar_lea.hbm %s393_s1, 2048 }
  0x14   :  { %p277_p8 = scmp.ne.s32.totalorder %s393_s1, %s276_s25  ;;  %p280_p9 = scmp.lt.u32.totalorder %s276_s25, %s393_s1 }
  0x16   :  { %p282_p10 = pnand %p280_p9, %p277_p8 }
  0x18   :  { %285 = shalt.err (!%p282_p10)
}
  0x19   :  { %s286_s30 = scalar_lea.vmem %s349_s12, 2048  ;;  %p291_p12 = scmp.lt.s32.totalorder %s349_s12, %s349_s12 }
  0x1a   :  { %p287_p11 = scmp.ne.s32.totalorder %s349_s12, %s286_s30  ;;  %p292_p13 = scmp.lt.s32.totalorder %s286_s30, %s286_s30 }
  0x1c   :  { %p293_p0 = por %p292_p13, %p291_p12 }
  0x1e   :  { %p294_p1 = pnand %p293_p0, %p287_p11 }
  0x20   :  { %297 = shalt.err (!%p294_p1)
}
  0x21   :  { %s328_s0 = smov 128   ;;  %s329_s3 = smov 8  }
  0x22   :  { %31 = dma.hbm_to_vmem [thread:$0]  %s393_s1, 2048, %s349_s12, [#allocation7], %s328_s0, %s328_s0, %s329_s3  }
  0x23   :  { %320 = dma.done.wait [#allocation4], 128  }
  0x24   :  { %321 = vsyncadd [#allocation4], 4294967168 }
  0x25   :  { %322 = dma.done.wait [#allocation7], 2048  }
  0x26   :  { %323 = vsyncadd [#allocation7], 4294965248  ;;  %v330_v0 = vmov 0.0|0.0   ;;  %vm331_vm0 = vmmov 0   ;;  %v332_v1 = vmov 0.0   ;;  %v43_v2 = vld [vmem:[#allocation6] sm:$0xff] }
  0x27   :  { %222 = vmatprep.subr.bf16.mxu0 %v330_v0  ;;  %219 = vmatprep.mubr.msk.f32.mxu0 %vm331_vm0, %v332_v1  ;;  %v44_v3 = vld [vmem:[#allocation6 + $0x8] sm:$0xff]  ;;  %v45_v4 = vld [vmem:[#allocation6 + $0x10] sm:$0xff]  ;;  %v59_v5 = vmax.f32 %v43_v2, 0.0  ;;  %v46_v7 = vld [vmem:[#allocation6 + $0x18] sm:$0xff]  ;;  %s333_s1 = smov [#allocation8]  }
  0x28   :  { %v60_v6 = vmax.f32 %v44_v3, 0.0  ;;  %v61_v8 = vmax.f32 %v45_v4, 0.0  ;;  %v62_v9 = vmax.f32 %v46_v7, 0.0  ;;  %v47_v10 = vld [vmem:[#allocation6 + $0x20] sm:$0xff]  ;;  %v48_v11 = vld [vmem:[#allocation6 + $0x28] sm:$0xff]  ;;  %v49_v16 = vld [vmem:[#allocation6 + $0x30] sm:$0xff] }
  0x29   :  { %v63_v14 = vmax.f32 %v47_v10, 0.0  ;;  %v64_v15 = vmax.f32 %v48_v11, 0.0  ;;  %v50_v17 = vld [vmem:[#allocation6 + $0x38] sm:$0xff]  ;;  %v65_v19 = vmax.f32 %v49_v16, 0.0  ;;  %v51_v21 = vld [vmem:[#allocation6 + $0x40] sm:$0xff]  ;;  %v52_v22 = vld [vmem:[#allocation6 + $0x48] sm:$0xff] }
  0x2a   :  { %v223_v12 = vpack.c.bf16 %v60_v6, %v59_v5  ;;  %v226_v13 = vpack.c.bf16 %v62_v9, %v61_v8  ;;  %v66_v20 = vmax.f32 %v50_v17, 0.0  ;;  %v67_v24 = vmax.f32 %v51_v21, 0.0  ;;  %v53_v26 = vld [vmem:[#allocation6 + $0x50] sm:$0xff]  ;;  %v54_v27 = vld [vmem:[#allocation6 + $0x58] sm:$0xff]  ;;  %v55_v31 = vld [vmem:[#allocation6 + $0x60] sm:$0xff]  ;;  %s160_s6 = sshll.u32 %s333_s1, 4  ;;  %s161_s6 = int_to_ptr.vmem [resolvable:$true] %s160_s6 }
  0x2b   :  { %v229_v18 = vpack.c.bf16 %v64_v15, %v63_v14  ;;  %v68_v25 = vmax.f32 %v52_v22, 0.0  ;;  %v69_v29 = vmax.f32 %v53_v26, 0.0  ;;  %v70_v30 = vmax.f32 %v54_v27, 0.0  ;;  %v56_v32 = vld [vmem:[#allocation6 + $0x68] sm:$0xff]  ;;  %v57_v36 = vld [vmem:[#allocation6 + $0x70] sm:$0xff]  ;;  %v58_v37 = vld [vmem:[#allocation6 + $0x78] sm:$0xff]  ;;  %p303_p3 = scmp.lt.s32.totalorder %s161_s6, %s161_s6 }
  0x2c   :  { %224 = vmatpush3.bf16.msra.mxu0 %v223_v12  ;;  %v232_v23 = vpack.c.bf16 %v66_v20, %v65_v19  ;;  %v71_v34 = vmax.f32 %v55_v31, 0.0  ;;  %v72_v35 = vmax.f32 %v56_v32, 0.0  ;;  %v73_v39 = vmax.f32 %v57_v36, 0.0  ;;  %v76_v42 = vld [vmem:[#allocation3] sm:$0xff]  ;;  %s298_s7 = scalar_lea.vmem %s161_s6, 128 }
  0x2d   :  { %225 = vmatprep.subr.bf16.mxu0 %v330_v0  ;;  %v235_v28 = vpack.c.bf16 %v68_v25, %v67_v24  ;;  %v238_v33 = vpack.c.bf16 %v70_v30, %v69_v29  ;;  %v74_v40 = vmax.f32 %v58_v37, 0.0  ;;  %p299_p2 = scmp.ne.s32.totalorder %s161_s6, %s298_s7  ;;  %p304_p4 = scmp.lt.s32.totalorder %s298_s7, %s298_s7 }
  0x2e   :  { %v241_v38 = vpack.c.bf16 %v72_v35, %v71_v34 }
  0x2f   :  { %v244_v41 = vpack.c.bf16 %v74_v40, %v73_v39  ;;  %p305_p5 = por %p304_p4, %p303_p3 }
  0x30   :  { %227 = vmatpush3.bf16.msra.mxu0 %v226_v13 }
  0x31   :  { %228 = vmatprep.subr.bf16.mxu0 %v330_v0  ;;  %p306_p6 = pnand %p305_p5, %p299_p2 }
  0x34   :  { %230 = vmatpush3.bf16.msra.mxu0 %v229_v18 }
  0x35   :  { %231 = vmatprep.subr.bf16.mxu0 %v330_v0 }
  0x38   :  { %233 = vmatpush3.bf16.msra.mxu0 %v232_v23 }
  0x39   :  { %234 = vmatprep.subr.bf16.mxu0 %v330_v0 }
  0x3c   :  { %236 = vmatpush3.bf16.msra.mxu0 %v235_v28 }
  0x3d   :  { %237 = vmatprep.subr.bf16.mxu0 %v330_v0 }
  0x40   :  { %239 = vmatpush3.bf16.msra.mxu0 %v238_v33 }
  0x41   :  { %240 = vmatprep.subr.bf16.mxu0 %v330_v0 }
  0x44   :  { %242 = vmatpush3.bf16.msra.mxu0 %v241_v38 }
  0x45   :  { %243 = vmatprep.subr.bf16.mxu0 %v330_v0 }
  0x48   :  { %245 = vmatpush3.bf16.msra.mxu0 %v244_v41 }
  0x4b   :  { %220 = vmatmul.mubr.f32.vlgmr.msra.gmra.mrb[0].mxu0 %v76_v42 }
 0x11e   :  { %v143_v43 = vpop.f32.mrb[0].mxu0 }
 0x11f   :  { %153 = vst [vmem:[#allocation8] sm:$0xff] %v143_v43  ;;  %v221_v44 = vpop.f32.mrb[1].mxu0 }
 0x120   :  { %309 = shalt.err (!%p306_p6)
}
 0x121   :  { %s310_s10 = scalar_lea.hbm %s394_s2, 128 }
 0x122   :  { %p311_p7 = scmp.ne.s32.totalorder %s394_s2, %s310_s10  ;;  %p314_p8 = scmp.lt.u32.totalorder %s310_s10, %s394_s2 }
 0x124   :  { %p316_p9 = pnand %p314_p8, %p311_p7 }
 0x126   :  { %319 = shalt.err (!%p316_p9)
}
 0x127   :  { %163 = dma.vmem_to_hbm [thread:$0]  %s161_s6, 128, %s394_s2, [#allocation5]  }
 0x128   :  { %324 = dma.done.wait [#allocation5], 128  }
 0x129   :  { %325 = vsyncadd [#allocation5], 4294967168 }
 0x12a   :  { %167 = vsyncpa [#allocation4], 1 }
 0x12b   :  { %168 = vsyncpa [#allocation7], 1 }
 0x12c   :  { %169 = vsyncpa [#allocation5], 1 }

</bundles_post_ra>
